<compile_context>
chip_gen: v6e
topology: v6e:2x2x1
jax: 0.10.0
libtpu: 0.0.40
codegen_flags: <defaults>
</compile_context>

<pallas_src>
import functools

import numpy as np
import jax
import jax.numpy as jnp
from jax.experimental import pallas as pl
from jax.experimental.pallas import tpu as pltpu


def lorentz_kernel(params_ref, w_ref, out_ref, *, num_lor):
    """params_ref: SMEM (3*L + 2,) = [w0(L), wp(L), g(L), eps_inf, c]
    w_ref:      VMEM (1, S_pad) frequency grid
    out_ref:    VMEM (3, S_pad) rows = [T, e2, e1]
    """
    w = w_ref[...]                       # (1, S_pad)
    w2 = w * w

    eps_inf = params_ref[3 * num_lor]    # scalar from SMEM
    c = params_ref[3 * num_lor + 1]      # = -4*pi*0.0033*d (folded constant)

    e2 = jnp.zeros_like(w)
    e1 = jnp.zeros_like(w)

    # L is tiny and static -> fully unrolled; per-oscillator params are
    # scalars (sregs), all vector work is per-lane VPU on (1, S_pad) vregs.
    for i in range(num_lor):
        w0 = params_ref[i]
        wp = params_ref[num_lor + i]
        g = params_ref[2 * num_lor + i]

        wp2 = wp * wp
        g2 = g * g
        w02 = w0 * w0

        diff = w02 - w2                              # (1, S_pad)
        denom = diff * diff + w2 * g2                # (1, S_pad)
        inv = 1.0 / denom                            # one divide, shared below

        e2 = e2 + (wp2 * (w * g)) * inv
        e1 = e1 + (wp2 * diff) * inv

    e1 = e1 + eps_inf

    mag = jnp.sqrt(e1 * e1 + e2 * e2)
    # Clamp guards f32 round-off when |e2| << |e1| (latent NaN in sqrt);
    # no effect on well-conditioned points.
    n = jnp.sqrt(jnp.maximum(mag + e1, 0.0) * 0.5)
    k = jnp.sqrt(jnp.maximum(mag - e1, 0.0) * 0.5)

    T = (4.0 * n) / ((n + 1.0) * (n + 1.0) + k * k) * jnp.exp(c * (k * w))

    # Single fused output slab: one writeback DMA.
    out_ref[0:1, :] = T
    out_ref[1:2, :] = e2
    out_ref[2:3, :] = e1


def lorentz_forward(w0_in, wp_in, g_in, eps_inf, d, w):
    """w0_in/wp_in/g_in: (L,), eps_inf/d: scalars, w: (S,).
    Returns (T, e2, e1), each shaped (S,) (matching torch.sum(..., 0))."""
    L = int(w0_in.shape[0])
    S = int(w.shape[0])
    S_pad = int(pl.cdiv(S, 128)) * 128
    f32 = jnp.float32

    # Lane-pad the frequency grid with its edge value (keeps padded lanes
    # numerically benign); padded lanes are sliced off below.
    w_f = jnp.asarray(w, f32)
    w_pad = jnp.pad(w_f, (0, S_pad - S), mode="edge").reshape(1, S_pad)

    # Fold the exp constant: exp(-4*pi*(d*k)*(0.0033*w)) == exp(c * k * w).
    c = jnp.asarray(-4.0 * np.pi * 0.0033, f32) * jnp.asarray(d, f32)
    params = jnp.concatenate([
        jnp.asarray(w0_in, f32),
        jnp.asarray(wp_in, f32),
        jnp.asarray(g_in, f32),
        jnp.asarray(eps_inf, f32).reshape(1),
        c.reshape(1),
    ])                                              # (3L + 2,) in SMEM

    cost = pl.CostEstimate(
        flops=(12 * L + 20) * S_pad,
        transcendentals=4 * S_pad,                  # 3 sqrt + 1 exp per lane
        bytes_accessed=4 * ((3 * L + 2) + S_pad + 3 * S_pad),
    )

    out = pl.pallas_call(
        functools.partial(lorentz_kernel, num_lor=L),
        out_shape=jax.ShapeDtypeStruct((3, S_pad), f32),
        in_specs=[
            pl.BlockSpec(memory_space=pltpu.MemorySpace.SMEM),   # params
            pl.BlockSpec(memory_space=pltpu.MemorySpace.VMEM),   # w grid
        ],
        out_specs=pl.BlockSpec(memory_space=pltpu.MemorySpace.VMEM),
        cost_estimate=cost,
    )(params, w_pad)

    T = out[0, :S]
    e2 = out[1, :S]
    e1 = out[2, :S]
    return T, e2, e1


def lorentz_reference(w0_in, wp_in, g_in, eps_inf, d, w):
    """Pure-JAX reference mirroring the PyTorch forward op-for-op."""
    w0 = w0_in[:, None]
    wp = wp_in[:, None]
    g = g_in[:, None]
    we = w[None, :]
    e2_num = wp**2 * (we * g)
    e1_num = wp**2 * (w0**2 - we**2)
    denom = (w0**2 - we**2) ** 2 + we**2 * g**2
    e2 = jnp.sum(e2_num / denom, axis=0)
    e1 = jnp.sum(e1_num / denom, axis=0) + eps_inf
    mag = jnp.sqrt(e1**2 + e2**2)
    n = jnp.sqrt((mag + e1) / 2)
    k = jnp.sqrt((mag - e1) / 2)
    T = (4 * n / ((n + 1) ** 2 + k**2)) * jnp.exp(-4 * np.pi * (d * k) * (0.0033 * w))
    return T, e2, e1


if __name__ == "__main__":
    # Flags-equivalent configuration (deterministic, in-script).
    num_lor = 4
    num_spectra = 300
    freq_low, freq_high = 0.5, 5.0

    # self.w = arange(freq_low, freq_high, (freq_high - freq_low)/num_spectra)
    w_grid = jnp.asarray(
        np.arange(freq_low, freq_high, (freq_high - freq_low) / num_spectra),
        dtype=jnp.float32,
    )
    assert w_grid.shape[0] == num_spectra

    key = jax.random.PRNGKey(0)
    k1, k2, k3 = jax.random.split(key, 3)
    w0_in = jax.random.uniform(k1, (num_lor,), jnp.float32, 1.0, 4.0)   # resonance freqs
    wp_in = jax.random.uniform(k2, (num_lor,), jnp.float32, 0.5, 3.0)   # plasma freqs
    g_in = jax.random.uniform(k3, (num_lor,), jnp.float32, 0.05, 0.5)   # damping
    eps_inf = jnp.float32(1.5)
    d = jnp.float32(50.0)

    T, e2, e1 = lorentz_forward(w0_in, wp_in, g_in, eps_inf, d, w_grid)
    jax.block_until_ready((T, e2, e1))

    T_ref, e2_ref, e1_ref = lorentz_reference(w0_in, wp_in, g_in, eps_inf, d, w_grid)

    # e1/e2 are plain rational sums: tight f32 tolerance.
    np.testing.assert_allclose(np.asarray(e2), np.asarray(e2_ref), rtol=1e-4, atol=1e-5)
    np.testing.assert_allclose(np.asarray(e1), np.asarray(e1_ref), rtol=1e-4, atol=1e-5)
    # T goes through sqrt(mag -/+ e1): when |e2| << |e1| this catastrophically
    # cancels and amplifies f32 round-off (observed ~4e-5 rel diff between two
    # equally-valid f32 evaluation orders), so a looser rtol is the correct
    # f32 expectation for T.
    np.testing.assert_allclose(np.asarray(T), np.asarray(T_ref), rtol=5e-4, atol=1e-6)

    print("KERNEL_OK")
</pallas_src>

<mosaic_0001>
module attributes {stable_mosaic.version = 11 : i64} {
  func.func @lorentz_kernel(%arg0: memref<14xf32, #tpu.memory_space<smem>>, %arg1: memref<1x384xf32, #tpu.memory_space<vmem>>, %arg2: memref<3x384xf32, #tpu.memory_space<vmem>>) attributes {dimension_semantics = [], scalar_prefetch = 0 : i64, scratch_operands = 0 : i64, tpu.core_type = #tpu.core_type<tc>} {
    %c0 = arith.constant 0 : index
    %c0_0 = arith.constant 0 : index
    %0 = vector.load %arg1[%c0, %c0_0] : memref<1x384xf32, #tpu.memory_space<vmem>>, vector<1x384xf32>
    %1 = arith.mulf %0, %0 : vector<1x384xf32>
    %c12 = arith.constant 12 : index
    %2 = memref.load %arg0[%c12] : memref<14xf32, #tpu.memory_space<smem>>
    %c13 = arith.constant 13 : index
    %3 = memref.load %arg0[%c13] : memref<14xf32, #tpu.memory_space<smem>>
    %cst = arith.constant 0.000000e+00 : f32
    %4 = vector.broadcast %cst : f32 to vector<1x384xf32>
    %cst_1 = arith.constant 0.000000e+00 : f32
    %5 = vector.broadcast %cst_1 : f32 to vector<1x384xf32>
    %c0_2 = arith.constant 0 : index
    %6 = memref.load %arg0[%c0_2] : memref<14xf32, #tpu.memory_space<smem>>
    %c4 = arith.constant 4 : index
    %7 = memref.load %arg0[%c4] : memref<14xf32, #tpu.memory_space<smem>>
    %c8 = arith.constant 8 : index
    %8 = memref.load %arg0[%c8] : memref<14xf32, #tpu.memory_space<smem>>
    %9 = arith.mulf %7, %7 : f32
    %10 = arith.mulf %8, %8 : f32
    %11 = arith.mulf %6, %6 : f32
    %12 = vector.broadcast %11 : f32 to vector<1x384xf32>
    %13 = arith.subf %12, %1 : vector<1x384xf32>
    %14 = arith.mulf %13, %13 : vector<1x384xf32>
    %15 = vector.broadcast %10 : f32 to vector<1x384xf32>
    %16 = arith.mulf %1, %15 : vector<1x384xf32>
    %17 = arith.addf %14, %16 : vector<1x384xf32>
    %cst_3 = arith.constant 1.000000e+00 : f32
    %18 = vector.broadcast %cst_3 : f32 to vector<1x384xf32>
    %19 = arith.divf %18, %17 : vector<1x384xf32>
    %20 = vector.broadcast %8 : f32 to vector<1x384xf32>
    %21 = arith.mulf %0, %20 : vector<1x384xf32>
    %22 = vector.broadcast %9 : f32 to vector<1x384xf32>
    %23 = arith.mulf %22, %21 : vector<1x384xf32>
    %24 = arith.mulf %23, %19 : vector<1x384xf32>
    %25 = arith.addf %4, %24 : vector<1x384xf32>
    %26 = vector.broadcast %9 : f32 to vector<1x384xf32>
    %27 = arith.mulf %26, %13 : vector<1x384xf32>
    %28 = arith.mulf %27, %19 : vector<1x384xf32>
    %29 = arith.addf %5, %28 : vector<1x384xf32>
    %c1 = arith.constant 1 : index
    %30 = memref.load %arg0[%c1] : memref<14xf32, #tpu.memory_space<smem>>
    %c5 = arith.constant 5 : index
    %31 = memref.load %arg0[%c5] : memref<14xf32, #tpu.memory_space<smem>>
    %c9 = arith.constant 9 : index
    %32 = memref.load %arg0[%c9] : memref<14xf32, #tpu.memory_space<smem>>
    %33 = arith.mulf %31, %31 : f32
    %34 = arith.mulf %32, %32 : f32
    %35 = arith.mulf %30, %30 : f32
    %36 = vector.broadcast %35 : f32 to vector<1x384xf32>
    %37 = arith.subf %36, %1 : vector<1x384xf32>
    %38 = arith.mulf %37, %37 : vector<1x384xf32>
    %39 = vector.broadcast %34 : f32 to vector<1x384xf32>
    %40 = arith.mulf %1, %39 : vector<1x384xf32>
    %41 = arith.addf %38, %40 : vector<1x384xf32>
    %cst_4 = arith.constant 1.000000e+00 : f32
    %42 = vector.broadcast %cst_4 : f32 to vector<1x384xf32>
    %43 = arith.divf %42, %41 : vector<1x384xf32>
    %44 = vector.broadcast %32 : f32 to vector<1x384xf32>
    %45 = arith.mulf %0, %44 : vector<1x384xf32>
    %46 = vector.broadcast %33 : f32 to vector<1x384xf32>
    %47 = arith.mulf %46, %45 : vector<1x384xf32>
    %48 = arith.mulf %47, %43 : vector<1x384xf32>
    %49 = arith.addf %25, %48 : vector<1x384xf32>
    %50 = vector.broadcast %33 : f32 to vector<1x384xf32>
    %51 = arith.mulf %50, %37 : vector<1x384xf32>
    %52 = arith.mulf %51, %43 : vector<1x384xf32>
    %53 = arith.addf %29, %52 : vector<1x384xf32>
    %c2 = arith.constant 2 : index
    %54 = memref.load %arg0[%c2] : memref<14xf32, #tpu.memory_space<smem>>
    %c6 = arith.constant 6 : index
    %55 = memref.load %arg0[%c6] : memref<14xf32, #tpu.memory_space<smem>>
    %c10 = arith.constant 10 : index
    %56 = memref.load %arg0[%c10] : memref<14xf32, #tpu.memory_space<smem>>
    %57 = arith.mulf %55, %55 : f32
    %58 = arith.mulf %56, %56 : f32
    %59 = arith.mulf %54, %54 : f32
    %60 = vector.broadcast %59 : f32 to vector<1x384xf32>
    %61 = arith.subf %60, %1 : vector<1x384xf32>
    %62 = arith.mulf %61, %61 : vector<1x384xf32>
    %63 = vector.broadcast %58 : f32 to vector<1x384xf32>
    %64 = arith.mulf %1, %63 : vector<1x384xf32>
    %65 = arith.addf %62, %64 : vector<1x384xf32>
    %cst_5 = arith.constant 1.000000e+00 : f32
    %66 = vector.broadcast %cst_5 : f32 to vector<1x384xf32>
    %67 = arith.divf %66, %65 : vector<1x384xf32>
    %68 = vector.broadcast %56 : f32 to vector<1x384xf32>
    %69 = arith.mulf %0, %68 : vector<1x384xf32>
    %70 = vector.broadcast %57 : f32 to vector<1x384xf32>
    %71 = arith.mulf %70, %69 : vector<1x384xf32>
    %72 = arith.mulf %71, %67 : vector<1x384xf32>
    %73 = arith.addf %49, %72 : vector<1x384xf32>
    %74 = vector.broadcast %57 : f32 to vector<1x384xf32>
    %75 = arith.mulf %74, %61 : vector<1x384xf32>
    %76 = arith.mulf %75, %67 : vector<1x384xf32>
    %77 = arith.addf %53, %76 : vector<1x384xf32>
    %c3 = arith.constant 3 : index
    %78 = memref.load %arg0[%c3] : memref<14xf32, #tpu.memory_space<smem>>
    %c7 = arith.constant 7 : index
    %79 = memref.load %arg0[%c7] : memref<14xf32, #tpu.memory_space<smem>>
    %c11 = arith.constant 11 : index
    %80 = memref.load %arg0[%c11] : memref<14xf32, #tpu.memory_space<smem>>
    %81 = arith.mulf %79, %79 : f32
    %82 = arith.mulf %80, %80 : f32
    %83 = arith.mulf %78, %78 : f32
    %84 = vector.broadcast %83 : f32 to vector<1x384xf32>
    %85 = arith.subf %84, %1 : vector<1x384xf32>
    %86 = arith.mulf %85, %85 : vector<1x384xf32>
    %87 = vector.broadcast %82 : f32 to vector<1x384xf32>
    %88 = arith.mulf %1, %87 : vector<1x384xf32>
    %89 = arith.addf %86, %88 : vector<1x384xf32>
    %cst_6 = arith.constant 1.000000e+00 : f32
    %90 = vector.broadcast %cst_6 : f32 to vector<1x384xf32>
    %91 = arith.divf %90, %89 : vector<1x384xf32>
    %92 = vector.broadcast %80 : f32 to vector<1x384xf32>
    %93 = arith.mulf %0, %92 : vector<1x384xf32>
    %94 = vector.broadcast %81 : f32 to vector<1x384xf32>
    %95 = arith.mulf %94, %93 : vector<1x384xf32>
    %96 = arith.mulf %95, %91 : vector<1x384xf32>
    %97 = arith.addf %73, %96 : vector<1x384xf32>
    %98 = vector.broadcast %81 : f32 to vector<1x384xf32>
    %99 = arith.mulf %98, %85 : vector<1x384xf32>
    %100 = arith.mulf %99, %91 : vector<1x384xf32>
    %101 = arith.addf %77, %100 : vector<1x384xf32>
    %102 = vector.broadcast %2 : f32 to vector<1x384xf32>
    %103 = arith.addf %101, %102 : vector<1x384xf32>
    %104 = arith.mulf %103, %103 : vector<1x384xf32>
    %105 = arith.mulf %97, %97 : vector<1x384xf32>
    %106 = arith.addf %104, %105 : vector<1x384xf32>
    %107 = math.sqrt %106 : vector<1x384xf32>
    %108 = arith.addf %107, %103 : vector<1x384xf32>
    %cst_7 = arith.constant 0.000000e+00 : f32
    %109 = vector.broadcast %cst_7 : f32 to vector<1x384xf32>
    %110 = arith.maximumf %108, %109 : vector<1x384xf32>
    %cst_8 = arith.constant 5.000000e-01 : f32
    %111 = vector.broadcast %cst_8 : f32 to vector<1x384xf32>
    %112 = arith.mulf %110, %111 : vector<1x384xf32>
    %113 = math.sqrt %112 : vector<1x384xf32>
    %114 = arith.subf %107, %103 : vector<1x384xf32>
    %cst_9 = arith.constant 0.000000e+00 : f32
    %115 = vector.broadcast %cst_9 : f32 to vector<1x384xf32>
    %116 = arith.maximumf %114, %115 : vector<1x384xf32>
    %cst_10 = arith.constant 5.000000e-01 : f32
    %117 = vector.broadcast %cst_10 : f32 to vector<1x384xf32>
    %118 = arith.mulf %116, %117 : vector<1x384xf32>
    %119 = math.sqrt %118 : vector<1x384xf32>
    %cst_11 = arith.constant 4.000000e+00 : f32
    %120 = vector.broadcast %cst_11 : f32 to vector<1x384xf32>
    %121 = arith.mulf %120, %113 : vector<1x384xf32>
    %cst_12 = arith.constant 1.000000e+00 : f32
    %122 = vector.broadcast %cst_12 : f32 to vector<1x384xf32>
    %123 = arith.addf %113, %122 : vector<1x384xf32>
    %cst_13 = arith.constant 1.000000e+00 : f32
    %124 = vector.broadcast %cst_13 : f32 to vector<1x384xf32>
    %125 = arith.addf %113, %124 : vector<1x384xf32>
    %126 = arith.mulf %123, %125 : vector<1x384xf32>
    %127 = arith.mulf %119, %119 : vector<1x384xf32>
    %128 = arith.addf %126, %127 : vector<1x384xf32>
    %129 = arith.divf %121, %128 : vector<1x384xf32>
    %130 = arith.mulf %119, %0 : vector<1x384xf32>
    %131 = vector.broadcast %3 : f32 to vector<1x384xf32>
    %132 = arith.mulf %131, %130 : vector<1x384xf32>
    %133 = math.exp %132 : vector<1x384xf32>
    %134 = arith.mulf %129, %133 : vector<1x384xf32>
    %c0_14 = arith.constant 0 : index
    %c0_15 = arith.constant 0 : index
    %135 = vector.load %arg2[%c0_14, %c0_15] : memref<3x384xf32, #tpu.memory_space<vmem>>, vector<1x384xf32>
    tpu.vector_store %arg2[%c0_14, %c0_15], %134 {strides = array<i32>} : memref<3x384xf32, #tpu.memory_space<vmem>>, vector<1x384xf32>,
    %c1_16 = arith.constant 1 : index
    %c0_17 = arith.constant 0 : index
    %136 = vector.load %arg2[%c1_16, %c0_17] : memref<3x384xf32, #tpu.memory_space<vmem>>, vector<1x384xf32>
    tpu.vector_store %arg2[%c1_16, %c0_17], %97 {strides = array<i32>} : memref<3x384xf32, #tpu.memory_space<vmem>>, vector<1x384xf32>,
    %c2_18 = arith.constant 2 : index
    %c0_19 = arith.constant 0 : index
    %137 = vector.load %arg2[%c2_18, %c0_19] : memref<3x384xf32, #tpu.memory_space<vmem>>, vector<1x384xf32>
    tpu.vector_store %arg2[%c2_18, %c0_19], %103 {strides = array<i32>} : memref<3x384xf32, #tpu.memory_space<vmem>>, vector<1x384xf32>,
    return
  }
}

</mosaic_0001>

<bundles_post_ra>
// kernel: tpu_custom_call.1
= control target key start
LH: loop header
LB: loop body
LE: loop exit
PB: predicated region body
PF: predicated region fallthrough
CT: control target
= control target key end

     0   :  { %7 = vsyncpa [#allocation5], 0  ;;  %s371_s0 = inlined_call_operand.hbm [shape: f32[14], index: 0, kind: input, shape index: {}]   ;;  %s372_s1 = inlined_call_operand.hbm [shape: f32[1,384], index: 1, kind: input, shape index: {}]   ;;  %s373_s2 = inlined_call_operand.hbm [shape: f32[3,384], index: 2, kind: output, shape index: {}]  }
   0x1   :  { %8 = vsyncpa [#allocation3], 0 }
   0x2   :  { %9 = vsyncpa [#allocation4], 0  ;;  %s289_s9 = smov [#allocation2]   ;;  %s290_s12 = smov [#allocation6]  }
   0x3   :  { %17 = dma.hbm_to_smem %s371_s0, 16, %s289_s9, [#allocation5]  }
   0x4   :  { %s24_s13 = sshll.u32 %s290_s12, 4  ;;  %s25_s13 = int_to_ptr.vmem [resolvable:$true] %s24_s13 }
   0x5   :  { %s251_s14 = scalar_lea.vmem %s25_s13, 48  ;;  %s255_s15 = scalar_lea.vmem %s25_s13, 64 }
   0x6   :  { %p252_p0 = scmp.ne.s32.totalorder %s25_s13, %s251_s14  ;;  %p256_p1 = scmp.lt.s32.totalorder %s25_s13, %s25_s13 }
   0x7   :  { %p257_p2 = scmp.lt.s32.totalorder %s255_s15, %s251_s14 }
   0x9   :  { %p258_p3 = por %p257_p2, %p256_p1 }
   0xb   :  { %p259_p4 = pnand %p258_p3, %p252_p0 }
   0xd   :  { %262 = shalt.err (!%p259_p4)
}
   0xe   :  { %27 = dma.hbm_to_vmem [thread:$0]  %s372_s1, 48, %s25_s13, [#allocation3]  }
   0xf   :  { %283 = dma.done.wait [#allocation5], 16  }
  0x10   :  { %284 = vsyncadd [#allocation5], 4294967280 }
  0x11   :  { %285 = dma.done.wait [#allocation3], 48  }
  0x12   :  { %286 = vsyncadd [#allocation3], 4294967248 }
  0x13   :  { %34 = sfence }
  0x14   :  { %s39_s0 = sld [smem:[#allocation2]]  ;;  %v313_v0 = vld [vmem:[#allocation6] sm:$0x7]  ;;  %v176_v55 = vlaneseq  ;;  %s291_s14 = smov [#allocation7]  }
  0x15   :  { %s315_s18 = sld [smem:[#allocation2 + $0x8]]  ;;  %v36_v1 = vmul.f32 %v313_v0, %v313_v0  ;;  %s191_s15 = sshll.u32 %s291_s14, 4  ;;  %s192_s15 = int_to_ptr.vmem [resolvable:$true] %s191_s15 }
  0x16   :  { %s205_s19 = sld [smem:[#allocation2 + $0x1]]  ;;  %vm357_vm0 = vcmp.lt.s32.totalorder %v176_v55, 384  ;;  %s263_s16 = scalar_lea.vmem %s192_s15, 192 }
  0x17   :  { %s319_s20 = sld [smem:[#allocation2 + $0x9]]  ;;  %p264_p5 = scmp.ne.s32.totalorder %s192_s15, %s263_s16 }
  0x18   :  { %s208_s1 = sld [smem:[#allocation2 + $0x2]]  ;;  %p268_p6 = scmp.lt.s32.totalorder %s192_s15, %s192_s15 }
  0x19   :  { %s323_s23 = sld [smem:[#allocation2 + $0xa]]  ;;  %p269_p7 = scmp.lt.s32.totalorder %s263_s16, %s263_s16 }
  0x1a   :  { %s44_s21 = smul.f32 %s39_s0, %s39_s0  ;;  %s211_s25 = sld [smem:[#allocation2 + $0x3]] }
  0x1b   :  { %s43_s22 = smul.f32 %s315_s18, %s315_s18  ;;  %s327_s27 = sld [smem:[#allocation2 + $0xb]]  ;;  %v53_v22 = vstv %s315_s18 }
  0x1c   :  { %v45_v2 = vstv %s44_s21  ;;  %s67_s24 = smul.f32 %s205_s19, %s205_s19  ;;  %s329_s28 = sld [smem:[#allocation2 + $0x4]]  ;;  %v54_v28 = vmul.f32 %v53_v22, %v313_v0 }
  0x1d   :  { %v46_v3 = vsub.f32 %v45_v2, %v36_v1  ;;  %v48_v4 = vstv %s43_s22  ;;  %s66_s26 = smul.f32 %s319_s20, %s319_s20  ;;  %s331_s30 = sld [smem:[#allocation2 + $0x5]]  ;;  %v76_v26 = vstv %s319_s20 }
  0x1e   :  { %v49_v6 = vmul.f32 %v48_v4, %v36_v1  ;;  %v68_v7 = vstv %s67_s24  ;;  %s90_s29 = smul.f32 %s208_s1, %s208_s1  ;;  %s335_s5 = sld [smem:[#allocation2 + $0x6]]  ;;  %v77_v30 = vmul.f32 %v76_v26, %v313_v0 }
  0x1f   :  { %v47_v5 = vmul.f32 %v46_v3, %v46_v3  ;;  %v69_v9 = vsub.f32 %v68_v7, %v36_v1  ;;  %v71_v10 = vstv %s66_s26  ;;  %s89_s3 = smul.f32 %s323_s23, %s323_s23  ;;  %s339_s7 = sld [smem:[#allocation2 + $0x7]]  ;;  %v99_v31 = vstv %s323_s23 }
  0x20   :  { %v72_v11 = vmul.f32 %v71_v10, %v36_v1  ;;  %v91_v12 = vstv %s90_s29  ;;  %s113_s4 = smul.f32 %s211_s25, %s211_s25  ;;  %v100_v37 = vmul.f32 %v99_v31, %v313_v0  ;;  %s201_s12 = sld [smem:[#allocation2 + $0xc]] }
  0x21   :  { %v50_v8 = vadd.f32 %v49_v6, %v47_v5  ;;  %v70_v13 = vmul.f32 %v69_v9, %v69_v9  ;;  %v92_v14 = vsub.f32 %v91_v12, %v36_v1  ;;  %v94_v15 = vstv %s89_s3  ;;  %s112_s6 = smul.f32 %s327_s27, %s327_s27  ;;  %s202_s13 = sld [smem:[#allocation2 + $0xd]] }
  0x22   :  { %v95_v17 = vmul.f32 %v94_v15, %v36_v1  ;;  %v114_v18 = vstv %s113_s4  ;;  %s42_s8 = smul.f32 %s329_s28, %s329_s28  ;;  %v122_v35 = vstv %s327_s27  ;;  %p270_p8 = por %p269_p7, %p268_p6 }
  0x23   :  { %217 = vrcp.f32 %v50_v8  ;;  %v73_v16 = vadd.f32 %v72_v11, %v70_v13  ;;  %v93_v19 = vmul.f32 %v92_v14, %v92_v14  ;;  %v115_v20 = vsub.f32 %v114_v18, %v36_v1  ;;  %s65_s9 = smul.f32 %s331_s30, %s331_s30 }
  0x24   :  { %v117_v21 = vstv %s112_s6  ;;  %v55_v29 = vstv %s42_s8  ;;  %s88_s10 = smul.f32 %s335_s5, %s335_s5  ;;  %v123_v41 = vmul.f32 %v122_v35, %v313_v0  ;;  %p271_p9 = pnand %p270_p8, %p264_p5 }
  0x25   :  { %219 = vrcp.f32 %v73_v16  ;;  %v96_v23 = vadd.f32 %v95_v17, %v93_v19  ;;  %v116_v24 = vmul.f32 %v115_v20, %v115_v20  ;;  %v118_v25 = vmul.f32 %v117_v21, %v36_v1  ;;  %s111_s11 = smul.f32 %s339_s7, %s339_s7 }
  0x26   :  { %v78_v32 = vstv %s65_s9  ;;  %v56_v33 = vmul.f32 %v55_v29, %v54_v28  ;;  %v59_v34 = vmul.f32 %v55_v29, %v46_v3  ;;  %v101_v40 = vstv %s88_s10 }
  0x27   :  { %221 = vrcp.f32 %v96_v23  ;;  %v119_v27 = vadd.f32 %v118_v25, %v116_v24  ;;  %v79_v38 = vmul.f32 %v78_v32, %v77_v30  ;;  %v82_v39 = vmul.f32 %v78_v32, %v69_v9 }
  0x28   :  { %v124_v44 = vstv %s111_s11  ;;  %v102_v46 = vmul.f32 %v101_v40, %v100_v37  ;;  %v105_v47 = vmul.f32 %v101_v40, %v92_v14  ;;  %v131_v63 = vstv %s201_s12 }
  0x29   :  { %223 = vrcp.f32 %v119_v27  ;;  %v125_v50 = vmul.f32 %v124_v44, %v123_v41  ;;  %v128_v51 = vmul.f32 %v124_v44, %v115_v20  ;;  %v171_v30 = vstv %s202_s13 }
  0x30   :  { %v218_v36 = vpop.eup %217 }
  0x31   :  { %v57_v42 = vmul.f32 %v218_v36, %v56_v33  ;;  %v60_v43 = vmul.f32 %v218_v36, %v59_v34 }
  0x32   :  { %v220_v45 = vpop.eup %219 }
  0x33   :  { %v80_v48 = vmul.f32 %v220_v45, %v79_v38  ;;  %v83_v49 = vmul.f32 %v220_v45, %v82_v39 }
  0x34   :  { %v222_v52 = vpop.eup %221 }
  0x35   :  { %v81_v53 = vadd.f32 %v80_v48, %v57_v42  ;;  %v84_v54 = vadd.f32 %v83_v49, %v60_v43  ;;  %v103_v56 = vmul.f32 %v222_v52, %v102_v46  ;;  %v106_v57 = vmul.f32 %v222_v52, %v105_v47 }
  0x36   :  { %v224_v58 = vpop.eup %223 }
  0x37   :  { %v104_v59 = vadd.f32 %v103_v56, %v81_v53  ;;  %v107_v60 = vadd.f32 %v106_v57, %v84_v54  ;;  %v126_v61 = vmul.f32 %v224_v58, %v125_v50  ;;  %v129_v62 = vmul.f32 %v224_v58, %v128_v51 }
  0x39   :  { %v127_v2 = vadd.f32 %v126_v61, %v104_v59  ;;  %v130_v3 = vadd.f32 %v129_v62, %v107_v60 }
  0x3b   :  { %v132_v4 = vadd.f32 %v131_v63, %v130_v3  ;;  %v134_v5 = vmul.f32 %v127_v2, %v127_v2  ;;  %182 = vst.msk [vmem:[#allocation7 + $0x1] ss:$4 sm:$0x7] %vm357_vm0, %v127_v2 }
  0x3d   :  { %v133_v6 = vmul.f32 %v132_v4, %v132_v4  ;;  %184 = vst.msk [vmem:[#allocation7 + $0x2] ss:$4 sm:$0x7] %vm357_vm0, %v132_v4 }
  0x3f   :  { %v135_v7 = vadd.f32 %v134_v5, %v133_v6 }
  0x41   :  { %225 = vrsqrt.f32 %v135_v7  ;;  %vm138_vm1 = vcmp.eq.f32.partialorder %v135_v7, inf  ;;  %v141_v9 = vand.u32 2147483648, %v135_v7  ;;  %vm140_vm2 = vcmp.eq.f32.partialorder %v135_v7, 0.0 }
  0x4e   :  { %v226_v8 = vpop.eup %225 }
  0x4f   :  { %v137_v10 = vmul.f32 %v226_v8, %v135_v7 }
  0x51   :  { %v139_v11 = vsel %vm138_vm1, %v135_v7, %v137_v10 }
  0x52   :  { %v142_v12 = vsel %vm140_vm2, %v141_v9, %v139_v11 }
  0x53   :  { %v143_v13 = vadd.f32 %v142_v12, %v132_v4  ;;  %v153_v14 = vsub.f32 %v142_v12, %v132_v4 }
  0x55   :  { %v144_v15 = vmax.f32 %v143_v13, 0.0  ;;  %v154_v16 = vmax.f32 %v153_v14, 0.0 }
  0x57   :  { %v145_v17 = vmul.f32 0.5, %v144_v15  ;;  %v155_v18 = vmul.f32 0.5, %v154_v16 }
  0x59   :  { %227 = vrsqrt.f32 %v145_v17  ;;  %vm148_vm3 = vcmp.eq.f32.partialorder %v145_v17, inf  ;;  %v151_v20 = vand.u32 2147483648, %v145_v17  ;;  %vm150_vm4 = vcmp.eq.f32.partialorder %v145_v17, 0.0 }
  0x5a   :  { %229 = vrsqrt.f32 %v155_v18  ;;  %vm158_vm5 = vcmp.eq.f32.partialorder %v155_v18, inf  ;;  %v161_v23 = vand.u32 2147483648, %v155_v18  ;;  %vm160_vm6 = vcmp.eq.f32.partialorder %v155_v18, 0.0 }
  0x66   :  { %v228_v19 = vpop.eup %227 }
  0x67   :  { %v230_v21 = vpop.eup %229  ;;  %v147_v22 = vmul.f32 %v228_v19, %v145_v17 }
  0x68   :  { %v157_v24 = vmul.f32 %v230_v21, %v155_v18 }
  0x69   :  { %v149_v25 = vsel %vm148_vm3, %v145_v17, %v147_v22 }
  0x6a   :  { %v152_v26 = vsel %vm150_vm4, %v151_v20, %v149_v25  ;;  %v159_v27 = vsel %vm158_vm5, %v155_v18, %v157_v24 }
  0x6b   :  { %v162_v28 = vsel %vm160_vm6, %v161_v23, %v159_v27  ;;  %v164_v29 = vadd.f32 1.0, %v152_v26  ;;  %v163_v37 = vmul.f32 4.0, %v152_v26 }
  0x6c   :  { %v166_v31 = vmul.f32 %v162_v28, %v162_v28  ;;  %v170_v32 = vmul.f32 %v162_v28, %v313_v0 }
  0x6d   :  { %v165_v33 = vmul.f32 %v164_v29, %v164_v29 }
  0x6e   :  { %v172_v34 = vmul.f32 %v171_v30, %v170_v32 }
  0x6f   :  { %v167_v35 = vadd.f32 %v166_v31, %v165_v33 }
  0x70   :  { %v173_v36 = vmul.f32 1.442695, %v172_v34 }
  0x71   :  { %231 = vrcp.f32 %v167_v35 }
  0x72   :  { %233 = vpow2.f32 %v173_v36 }
  0x7e   :  { %v232_v38 = vpop.eup %231 }
  0x7f   :  { %v234_v39 = vpop.eup %233  ;;  %v169_v40 = vmul.f32 %v232_v38, %v163_v37 }
  0x81   :  { %v175_v41 = vmul.f32 %v234_v39, %v169_v40 }
  0x83   :  { %180 = vst.msk [vmem:[#allocation7] ss:$4 sm:$0x7] %vm357_vm0, %v175_v41 }
  0x84   :  { %274 = shalt.err (!%p271_p9)
}
  0x85   :  { %194 = dma.vmem_to_hbm [thread:$0]  %s192_s15, 192, %s373_s2, [#allocation4]  }
  0x86   :  { %287 = dma.done.wait [#allocation4], 192  }
  0x87   :  { %288 = vsyncadd [#allocation4], 4294967104 }
  0x88   :  { %198 = vsyncpa [#allocation3], 1 }
  0x89   :  { %199 = vsyncpa [#allocation4], 1 }
  0x8a   :  { %200 = vsyncpa [#allocation5], 1 }

</bundles_post_ra>
